<compile_context>
chip_gen: v7x
topology: tpu7x:2x2x1
jax: 0.10.0
libtpu: 0.0.40
codegen_flags: <defaults>
</compile_context>

<pallas_src>
import jax
import jax.numpy as jnp
from jax.experimental import pallas as pl
from jax.experimental.pallas import tpu as pltpu

_LANES = 128


def _fmix32(x):
    """murmur3 32-bit finalizer: full avalanche, pure VPU integer ops."""
    x = x ^ (x >> jnp.uint32(16))
    x = x * jnp.uint32(0x85EBCA6B)
    x = x ^ (x >> jnp.uint32(13))
    x = x * jnp.uint32(0xC2B2AE35)
    x = x ^ (x >> jnp.uint32(16))
    return x


def _scalar_noise_kernel(seed_ref, param_ref, x_ref, o_ref):
    # seed_ref:  SMEM (1,) int32    -- RNG seed
    # param_ref: SMEM (1,) float32  -- raw (inverse-softplus) std parameter
    # x_ref:     VMEM (R, 128) float32   (R even)
    # o_ref:     VMEM (R, 128) float32
    R, D = x_ref.shape
    half = R // 2

    # sigma = softplus(param), numerically stable, computed on a (1,1) vector.
    p = jnp.full((1, 1), param_ref[0], dtype=jnp.float32)
    sigma = jnp.maximum(p, 0.0) + jnp.log(1.0 + jnp.exp(-jnp.abs(p)))

    # Counter-based uniform bits: one pair of 32-bit draws per TWO outputs.
    seed = seed_ref[0].astype(jnp.uint32)
    row = jax.lax.broadcasted_iota(jnp.uint32, (half, D), 0)
    col = jax.lax.broadcasted_iota(jnp.uint32, (half, D), 1)
    ctr = row * jnp.uint32(D) + col
    base = ctr * jnp.uint32(2) + (seed + jnp.uint32(1)) * jnp.uint32(0x9E3779B9)
    b1 = _fmix32(base)
    b2 = _fmix32(base + jnp.uint32(1))

    # Top 24 bits -> uniforms; u1 is strictly in (0, 1) so log() never sees 0.
    inv24 = jnp.float32(1.0 / (1 << 24))
    u1 = ((b1 >> jnp.uint32(8)).astype(jnp.int32).astype(jnp.float32) + 0.5) * inv24
    u2 = (b2 >> jnp.uint32(8)).astype(jnp.int32).astype(jnp.float32) * inv24

    # Box-Muller, keeping BOTH outputs (halves EUP transcendental traffic).
    r = jnp.sqrt(-2.0 * jnp.log(u1))
    theta = (2.0 * jnp.pi) * u2
    z = jnp.concatenate([r * jnp.cos(theta), r * jnp.sin(theta)], axis=0)  # (R, D)

    o_ref[...] = x_ref[...] + z * sigma


def scalar_noise_forward(x, param_raw, seed):
    """x: any-shape float tensor; param_raw: (1,) f32 inverse-softplus std;
    seed: (1,) int32.  Returns x + N(0,1)*softplus(param_raw), same shape/dtype."""
    orig_shape = x.shape
    orig_dtype = x.dtype
    total = x.size

    # Lane-dense slab: flatten to (rows, 128); pad so rows is even (the kernel
    # fills the block as two Box-Muller halves) and all lanes are full.
    chunk = 2 * _LANES
    padded = ((total + chunk - 1) // chunk) * chunk
    xf = jnp.ravel(x).astype(jnp.float32)
    if padded != total:
        xf = jnp.pad(xf, (0, padded - total))
    rows = padded // _LANES
    x2 = xf.reshape(rows, _LANES)

    out = pl.pallas_call(
        _scalar_noise_kernel,
        out_shape=jax.ShapeDtypeStruct((rows, _LANES), jnp.float32),
        in_specs=[
            pl.BlockSpec(memory_space=pltpu.SMEM),   # seed
            pl.BlockSpec(memory_space=pltpu.SMEM),   # raw param
            pl.BlockSpec(memory_space=pltpu.VMEM),   # x: single full block, no grid
        ],
        out_specs=pl.BlockSpec(memory_space=pltpu.VMEM),
    )(seed, param_raw.astype(jnp.float32), x2)

    out = out.reshape(-1)[:total].reshape(orig_shape).astype(orig_dtype)
    return out


def softplus_inv(t):
    """y = log(exp(t) - 1), mirrors ScalarNoise._softplus_inv (param setup glue)."""
    return jnp.log(jnp.exp(t) - 1.0)


if __name__ == "__main__":
    key = jax.random.PRNGKey(0)
    k_x, _ = jax.random.split(key)

    # Module config: dim=32 (std-dev shared across all dims), scalar param.
    dim = 32
    batch, seq = 2, 8
    std = jnp.array([0.5], dtype=jnp.float32)        # "param" passed to __init__
    param_raw = softplus_inv(std)                     # stored nn.Parameter value

    x = jax.random.normal(k_x, (batch, seq, dim), dtype=jnp.float32)
    seed = jnp.array([0], dtype=jnp.int32)

    out = scalar_noise_forward(x, param_raw, seed)
    out = jax.block_until_ready(out)

    # Sanity checks: shape/dtype preserved, noise stats ~ N(0, softplus(param)).
    assert out.shape == x.shape and out.dtype == x.dtype
    noise = out - x
    sigma = float(jax.nn.softplus(param_raw)[0])
    emp_std = float(jnp.std(noise))
    emp_mean = float(jnp.mean(noise))
    assert abs(emp_std - sigma) < 0.2 * sigma + 0.1, (emp_std, sigma)
    assert abs(emp_mean) < 0.2, emp_mean

    print("KERNEL_OK")
</pallas_src>

<mosaic_0001>
module attributes {stable_mosaic.version = 11 : i64} {
  func.func @_scalar_noise_kernel(%arg0: memref<1xi32, #tpu.memory_space<smem>>, %arg1: memref<1xf32, #tpu.memory_space<smem>>, %arg2: memref<4x128xf32, #tpu.memory_space<vmem>>, %arg3: memref<4x128xf32, #tpu.memory_space<vmem>>) attributes {dimension_semantics = [], scalar_prefetch = 0 : i64, scratch_operands = 0 : i64, tpu.core_type = #tpu.core_type<tc>} {
    %c0 = arith.constant 0 : index
    %0 = memref.load %arg1[%c0] : memref<1xf32, #tpu.memory_space<smem>>
    %1 = vector.broadcast %0 : f32 to vector<1x1xf32>
    %cst = arith.constant 0.000000e+00 : f32
    %2 = vector.broadcast %cst : f32 to vector<1x1xf32>
    %3 = arith.maximumf %1, %2 : vector<1x1xf32>
    %4 = math.absf %1 : vector<1x1xf32>
    %cst_0 = arith.constant 0.000000e+00 : f32
    %5 = vector.broadcast %cst_0 : f32 to vector<1x1xf32>
    %6 = arith.subf %5, %4 : vector<1x1xf32>
    %7 = math.exp %6 : vector<1x1xf32>
    %cst_1 = arith.constant 1.000000e+00 : f32
    %8 = vector.broadcast %cst_1 : f32 to vector<1x1xf32>
    %9 = arith.addf %8, %7 : vector<1x1xf32>
    %10 = math.log %9 : vector<1x1xf32>
    %11 = arith.addf %3, %10 : vector<1x1xf32>
    %c0_2 = arith.constant 0 : index
    %12 = memref.load %arg0[%c0_2] : memref<1xi32, #tpu.memory_space<smem>>
    %13 = tpu.iota {dimensions = array<i32: 0>} : vector<2x128xi32>
    %14 = tpu.iota {dimensions = array<i32: 1>} : vector<2x128xi32>
    %c128_i32 = arith.constant 128 : i32
    %15 = vector.broadcast %c128_i32 : i32 to vector<2x128xi32>
    %16 = arith.muli %13, %15 : vector<2x128xi32>
    %17 = arith.addi %16, %14 : vector<2x128xi32>
    %c2_i32 = arith.constant 2 : i32
    %18 = vector.broadcast %c2_i32 : i32 to vector<2x128xi32>
    %19 = arith.muli %17, %18 : vector<2x128xi32>
    %c1_i32 = arith.constant 1 : i32
    %20 = arith.addi %12, %c1_i32 : i32
    %c-1640531527_i32 = arith.constant -1640531527 : i32
    %21 = arith.muli %20, %c-1640531527_i32 : i32
    %22 = vector.broadcast %21 : i32 to vector<2x128xi32>
    %23 = arith.addi %19, %22 : vector<2x128xi32>
    %c16_i32 = arith.constant 16 : i32
    %24 = vector.broadcast %c16_i32 : i32 to vector<2x128xi32>
    %25 = arith.shrui %23, %24 : vector<2x128xi32>
    %26 = arith.xori %23, %25 : vector<2x128xi32>
    %c-2048144789_i32 = arith.constant -2048144789 : i32
    %27 = vector.broadcast %c-2048144789_i32 : i32 to vector<2x128xi32>
    %28 = arith.muli %26, %27 : vector<2x128xi32>
    %c13_i32 = arith.constant 13 : i32
    %29 = vector.broadcast %c13_i32 : i32 to vector<2x128xi32>
    %30 = arith.shrui %28, %29 : vector<2x128xi32>
    %31 = arith.xori %28, %30 : vector<2x128xi32>
    %c-1028477387_i32 = arith.constant -1028477387 : i32
    %32 = vector.broadcast %c-1028477387_i32 : i32 to vector<2x128xi32>
    %33 = arith.muli %31, %32 : vector<2x128xi32>
    %c16_i32_3 = arith.constant 16 : i32
    %34 = vector.broadcast %c16_i32_3 : i32 to vector<2x128xi32>
    %35 = arith.shrui %33, %34 : vector<2x128xi32>
    %36 = arith.xori %33, %35 : vector<2x128xi32>
    %c1_i32_4 = arith.constant 1 : i32
    %37 = vector.broadcast %c1_i32_4 : i32 to vector<2x128xi32>
    %38 = arith.addi %23, %37 : vector<2x128xi32>
    %c16_i32_5 = arith.constant 16 : i32
    %39 = vector.broadcast %c16_i32_5 : i32 to vector<2x128xi32>
    %40 = arith.shrui %38, %39 : vector<2x128xi32>
    %41 = arith.xori %38, %40 : vector<2x128xi32>
    %c-2048144789_i32_6 = arith.constant -2048144789 : i32
    %42 = vector.broadcast %c-2048144789_i32_6 : i32 to vector<2x128xi32>
    %43 = arith.muli %41, %42 : vector<2x128xi32>
    %c13_i32_7 = arith.constant 13 : i32
    %44 = vector.broadcast %c13_i32_7 : i32 to vector<2x128xi32>
    %45 = arith.shrui %43, %44 : vector<2x128xi32>
    %46 = arith.xori %43, %45 : vector<2x128xi32>
    %c-1028477387_i32_8 = arith.constant -1028477387 : i32
    %47 = vector.broadcast %c-1028477387_i32_8 : i32 to vector<2x128xi32>
    %48 = arith.muli %46, %47 : vector<2x128xi32>
    %c16_i32_9 = arith.constant 16 : i32
    %49 = vector.broadcast %c16_i32_9 : i32 to vector<2x128xi32>
    %50 = arith.shrui %48, %49 : vector<2x128xi32>
    %51 = arith.xori %48, %50 : vector<2x128xi32>
    %c8_i32 = arith.constant 8 : i32
    %52 = vector.broadcast %c8_i32 : i32 to vector<2x128xi32>
    %53 = arith.shrui %36, %52 : vector<2x128xi32>
    %54 = arith.sitofp %53 : vector<2x128xi32> to vector<2x128xf32>
    %cst_10 = arith.constant 5.000000e-01 : f32
    %55 = vector.broadcast %cst_10 : f32 to vector<2x128xf32>
    %56 = arith.addf %54, %55 : vector<2x128xf32>
    %cst_11 = arith.constant 5.96046448E-8 : f32
    %57 = vector.broadcast %cst_11 : f32 to vector<2x128xf32>
    %58 = arith.mulf %56, %57 : vector<2x128xf32>
    %c8_i32_12 = arith.constant 8 : i32
    %59 = vector.broadcast %c8_i32_12 : i32 to vector<2x128xi32>
    %60 = arith.shrui %51, %59 : vector<2x128xi32>
    %61 = arith.sitofp %60 : vector<2x128xi32> to vector<2x128xf32>
    %cst_13 = arith.constant 5.96046448E-8 : f32
    %62 = vector.broadcast %cst_13 : f32 to vector<2x128xf32>
    %63 = arith.mulf %61, %62 : vector<2x128xf32>
    %64 = math.log %58 : vector<2x128xf32>
    %cst_14 = arith.constant -2.000000e+00 : f32
    %65 = vector.broadcast %cst_14 : f32 to vector<2x128xf32>
    %66 = arith.mulf %65, %64 : vector<2x128xf32>
    %67 = math.sqrt %66 : vector<2x128xf32>
    %cst_15 = arith.constant 6.28318548 : f32
    %68 = vector.broadcast %cst_15 : f32 to vector<2x128xf32>
    %69 = arith.mulf %68, %63 : vector<2x128xf32>
    %70 = math.cos %69 : vector<2x128xf32>
    %71 = arith.mulf %67, %70 : vector<2x128xf32>
    %72 = math.sin %69 : vector<2x128xf32>
    %73 = arith.mulf %67, %72 : vector<2x128xf32>
    %74 = tpu.concatenate %71, %73 in 0 : vector<2x128xf32>, vector<2x128xf32> -> vector<4x128xf32>
    %c0_16 = arith.constant 0 : index
    %c0_17 = arith.constant 0 : index
    %75 = vector.load %arg2[%c0_16, %c0_17] : memref<4x128xf32, #tpu.memory_space<vmem>>, vector<4x128xf32>
    %76 = vector.broadcast %11 : vector<1x1xf32> to vector<4x128xf32>
    %77 = arith.mulf %74, %76 : vector<4x128xf32>
    %78 = arith.addf %75, %77 : vector<4x128xf32>
    %c0_18 = arith.constant 0 : index
    %c0_19 = arith.constant 0 : index
    %79 = vector.load %arg3[%c0_18, %c0_19] : memref<4x128xf32, #tpu.memory_space<vmem>>, vector<4x128xf32>
    tpu.vector_store %arg3[%c0_18, %c0_19], %78 {strides = array<i32>} : memref<4x128xf32, #tpu.memory_space<vmem>>, vector<4x128xf32>,
    return
  }
}

</mosaic_0001>

<bundles_post_ra>
// kernel: tpu_custom_call.1
= control target key start
LH: loop header
LB: loop body
LE: loop exit
PB: predicated region body
PF: predicated region fallthrough
CT: control target
= control target key end

     0   :  { %10 = vsyncpa [#allocation5], 0  ;;  %v29_v0 = vlaneseq  ;;  %v362_v39 = vmov 683565275   ;;  %v363_v41 = vmov 2475754826   ;;  %s440_s0 = inlined_call_operand.<no memory space> [shape: s32[1], index: 0, kind: input, shape index: {}]   ;;  %s441_s1 = inlined_call_operand.<no memory space> [shape: f32[1], index: 1, kind: input, shape index: {}]   ;;  %s442_s2 = inlined_call_operand.vmem [shape: f32[4,128], index: 2, kind: input, shape index: {}]   ;;  %s443_s3 = inlined_call_operand.hbm [shape: f32[4,128], index: 3, kind: output, shape index: {}]  }
   0x1   :  { %s36_s14 = sadd.s32 1, %s440_s0  ;;  %v364_v43 = vmov 2131351028   ;;  %v365_v50 = vmov 2102212464   ;;  %s368_s22 = smov [#allocation4]  }
   0x2   :  { %v30_v1 = vshrl.u32 %v29_v0, 7  ;;  %v32_v2 = vand.u32 127, %v29_v0  ;;  %s37_s15 = smul.u32 2654435769, %s36_s14  ;;  %v366_v53 = vmov 920167782  }
   0x3   :  { %v367_v56 = vmov 1326507024   ;;  %s299_s23 = sshll.u32 %s368_s22, 4  ;;  %s300_s23 = int_to_ptr.vmem [resolvable:$true] %s299_s23 }
   0x4   :  { %v33_v3 = vmul.u32 128, %v30_v1  ;;  %v38_v5 = vstv %s37_s15  ;;  %s338_s24 = scalar_lea.vmem %s300_s23, 64  ;;  %p343_p1 = scmp.lt.s32.totalorder %s300_s23, %s300_s23 }
   0x5   :  { %p339_p0 = scmp.ne.s32.totalorder %s300_s23, %s338_s24  ;;  %p344_p2 = scmp.lt.s32.totalorder %s338_s24, %s338_s24 }
   0x6   :  { %v34_v4 = vadd.s32 %v33_v3, %v32_v2 }
   0x7   :  { %p345_p3 = por %p344_p2, %p343_p1 }
   0x8   :  { %v35_v6 = vmul.u32 2, %v34_v4 }
   0x9   :  { %p346_p4 = pnand %p345_p3, %p339_p0 }
   0xa   :  { %v39_v7 = vadd.s32 %v38_v5, %v35_v6 }
   0xc   :  { %v48_v8 = vadd.s32 1, %v39_v7  ;;  %v40_v14 = vshrl.u32 %v39_v7, 16 }
   0xe   :  { %v49_v9 = vshrl.u32 %v48_v8, 16  ;;  %v41_v17 = vxor.u32 %v40_v14, %v39_v7 }
  0x10   :  { %v50_v10 = vxor.u32 %v49_v9, %v48_v8  ;;  %v42_v20 = vmul.u32 2246822507, %v41_v17 }
  0x12   :  { %v51_v11 = vmul.u32 2246822507, %v50_v10  ;;  %v43_v23 = vshrl.u32 %v42_v20, 13 }
  0x14   :  { %v52_v12 = vshrl.u32 %v51_v11, 13  ;;  %v44_v26 = vxor.u32 %v43_v23, %v42_v20  ;;  %v18_v23 = vstv %s441_s1 }
  0x16   :  { %v53_v13 = vxor.u32 %v52_v12, %v51_v11  ;;  %v45_v30 = vmul.u32 3266489909, %v44_v26 }
  0x18   :  { %v54_v15 = vmul.u32 3266489909, %v53_v13  ;;  %v46_v33 = vshrl.u32 %v45_v30, 16 }
  0x1a   :  { %v55_v16 = vshrl.u32 %v54_v15, 16  ;;  %v47_v45 = vxor.u32 %v46_v33, %v45_v30 }
  0x1c   :  { %v56_v18 = vxor.u32 %v55_v16, %v54_v15  ;;  %v57_v8 = vshrl.u32 %v47_v45, 8 }
  0x1e   :  { %v61_v19 = vshrl.u32 %v56_v18, 8  ;;  %v58_v17 = vcvt.s32.f32 %v57_v8  ;;  %v19_v8 = vmax.f32 %v18_v23, 0.0 }
  0x20   :  { %v62_v21 = vcvt.s32.f32 %v61_v19 }
  0x22   :  { %v63_v22 = vmul.f32 5.9604645e-08, %v62_v21  ;;  %v59_v21 = vadd.f32 0.5, %v58_v17 }
  0x24   :  { %v392_v24 = vmul.f32 6.2831855, %v63_v22  ;;  %v60_v26 = vmul.f32 5.9604645e-08, %v59_v21 }
  0x26   :  { %v78_v25 = vand.u32 2139095040, %v392_v24  ;;  %v75_v27 = vand.u32 2147483647, %v392_v24  ;;  %326 = vlog2.f32 %v60_v26  ;;  %vm77_vm7 = vcmp.lt.s32.totalorder %v392_v24, 0 }
  0x28   :  { %v79_v28 = vshrl.u32 %v78_v25, 23  ;;  %v82_v31 = vand.u32 8388607, %v75_v27  ;;  %vm76_vm8 = vcmp.le.f32.partialorder %v75_v27, 0.7853982 }
  0x2a   :  { %v307_v29 = vadd.s32 4294967169, %v79_v28  ;;  %v83_v34 = vor.u32 8388608, %v82_v31  ;;  %v20_v28 = vand.u32 2147483647, %v18_v23 }
  0x2c   :  { %v85_v32 = vadd.s32 1, %v307_v29  ;;  %v123_v46 = vshll.u32 %v83_v34, 8  ;;  %v21_v31 = vsub.f32 0.0, %v20_v28 }
  0x2e   :  { %vm86_vm0 = vcmp.gt.s32.totalorder %v85_v32, 0  ;;  %v22_v34 = vmul.f32 1.442695, %v21_v31 }
  0x2f   :  { %v87_v35 = vsel %vm86_vm0, %v85_v32, 0 }
  0x30   :  { %v89_v36 = vand.u32 31, %v87_v35  ;;  %v88_v37 = vshrl.u32 %v87_v35, 5  ;;  %328 = vpow2.f32 %v22_v34 }
  0x32   :  { %v90_v38 = vsub.s32 32, %v89_v36  ;;  %v92_v40 = vshll.u32 %v362_v39, %v89_v36  ;;  %v95_v42 = vshll.u32 %v363_v41, %v89_v36  ;;  %v98_v44 = vshll.u32 %v364_v43, %v89_v36 }
  0x33   :  { %v101_v52 = vshll.u32 %v365_v50, %v89_v36  ;;  %v104_v55 = vshll.u32 %v366_v53, %v89_v36  ;;  %vm107_vm1 = vcmp.lt.s32.totalorder %v88_v37, 1  ;;  %vm108_vm2 = vcmp.lt.s32.totalorder %v88_v37, 2 }
  0x34   :  { %v91_v47 = vshrl.u32 %v362_v39, %v90_v38  ;;  %v93_v48 = vshrl.u32 %v363_v41, %v90_v38  ;;  %v96_v49 = vshrl.u32 %v364_v43, %v90_v38  ;;  %v99_v51 = vshrl.u32 %v365_v50, %v90_v38 }
  0x35   :  { %v102_v54 = vshrl.u32 %v366_v53, %v90_v38  ;;  %v105_v57 = vshrl.u32 %v367_v56, %v90_v38  ;;  %vm109_vm3 = vcmp.lt.s32.totalorder %v88_v37, 3  ;;  %vm110_vm4 = vcmp.lt.s32.totalorder %v88_v37, 4  ;;  %v327_v38 = vpop.eup %326 }
  0x36   :  { %v94_v58 = vor.u32 %v93_v48, %v92_v40  ;;  %v97_v59 = vor.u32 %v96_v49, %v95_v42  ;;  %v100_v60 = vor.u32 %v99_v51, %v98_v44  ;;  %v65_v43 = vmul.f32 0.6931472, %v327_v38 }
  0x37   :  { %v103_v61 = vor.u32 %v102_v54, %v101_v52  ;;  %v106_v62 = vor.u32 %v105_v57, %v104_v55 }
  0x38   :  { %v111_v63 = vsel %vm107_vm1, %v91_v47, %v94_v58  ;;  %v115_v0 = vsel %vm107_vm1, %v94_v58, %v97_v59  ;;  %v119_v1 = vsel %vm107_vm1, %v97_v59, %v100_v60  ;;  %v112_v2 = vsel %vm110_vm4, %v100_v60, 2102212464 }
  0x39   :  { %v116_v3 = vsel %vm110_vm4, %v103_v61, 920167782  ;;  %v120_v4 = vsel %vm110_vm4, %v106_v62, 1326507024  ;;  %v113_v5 = vsel %vm109_vm3, %v97_v59, %v112_v2  ;;  %v66_v48 = vmul.f32 -2.0, %v65_v43 }
  0x3a   :  { %v117_v6 = vsel %vm109_vm3, %v100_v60, %v116_v3  ;;  %v121_v7 = vsel %vm109_vm3, %v103_v61, %v120_v4  ;;  %v114_v9 = vsel %vm108_vm2, %v111_v63, %v113_v5  ;;  %v329_v51 = vpop.eup %328  ;;  %vm167_vm1 = vweird.f32 %v392_v24 }
  0x3b   :  { %v118_v10 = vsel %vm108_vm2, %v115_v0, %v117_v6  ;;  %v122_v11 = vsel %vm108_vm2, %v119_v1, %v121_v7  ;;  %v130_v16 = vmul.u32 %v123_v46, %v114_v9  ;;  %330 = vrsqrt.f32 %v66_v48 }
  0x3c   :  { %v398_v12 = vmul.u32.u64.low %v123_v46, %v122_v11  ;;  %v399_v13 = vmul.u32.u64.high %v123_v46, %v122_v11, %v398_v12  ;;  %v401_v14 = vmul.u32.u64.low %v123_v46, %v118_v10  ;;  %v402_v15 = vmul.u32.u64.high %v123_v46, %v118_v10, %v401_v14 }
  0x3d   :  { %v24_v55 = vadd.f32 1.0, %v329_v51  ;;  %vm69_vm9 = vcmp.eq.f32.partialorder %v66_v48, inf  ;;  %vm71_vm10 = vcmp.eq.f32.partialorder %v66_v48, 0.0  ;;  %v72_v4 = vand.u32 2147483648, %v66_v48 }
  0x3e   :  { %vm132_vm5 = vc.u32 %v399_v13, %v401_v14  ;;  %v133_v18 = vadd.s32 1, %v402_v15  ;;  %v131_v37 = vadd.s32 %v401_v14, %v399_v13  ;;  %vm287_vm2 = vcmask 1041408  }
  0x3f   :  { %332 = vlog2.f32 %v24_v55 }
  0x40   :  { %v134_v19 = vsel %vm132_vm5, %v133_v18, %v402_v15 }
  0x41   :  { %v135_v20 = vadd.s32 %v134_v19, %v130_v16 }
  0x43   :  { %v136_v22 = vadd.s32 536870912, %v135_v20 }
  0x45   :  { %v137_v25 = vshrl.u32 %v136_v22, 30  ;;  %v331_v62 = vpop.eup %330 }
  0x46   :  { %v68_v1 = vmul.f32 %v331_v62, %v66_v48 }
  0x47   :  { %v138_v29 = vshll.u32 %v137_v25, 30  ;;  %v161_v53 = vsub.s32 4, %v137_v25 }
  0x48   :  { %v70_v5 = vsel %vm69_vm9, %v66_v48, %v68_v1 }
  0x49   :  { %v139_v30 = vsub.s32 %v135_v20, %v138_v29  ;;  %v162_v57 = vsel %vm77_vm7, %v161_v53, %v137_v25  ;;  %v333_v2 = vpop.eup %332  ;;  %v73_v12 = vsel %vm71_vm10, %v72_v4, %v70_v5 }
  0x4a   :  { %v164_v60 = vsel %vm76_vm8, 0, %v162_v57  ;;  %v26_v11 = vmul.f32 0.6931472, %v333_v2 }
  0x4b   :  { %v141_v32 = vsub.s32 0, %v139_v30  ;;  %v272_v61 = vadd.s32 3, %v164_v60  ;;  %v168_v63 = vand.u32 3, %v164_v60 }
  0x4c   :  { %v27_v21 = vadd.f32 %v26_v11, %v19_v8 }
  0x4d   :  { %v308_v33 = vmin.u32 %v141_v32, %v139_v30  ;;  %v273_v0 = vand.u32 3, %v272_v61  ;;  %vm173_vm11 = vcmp.eq.s32.totalorder %v168_v63, 2  ;;  %vm170_vm13 = vcmp.eq.s32.totalorder %v168_v63, 0 }
  0x4e   :  { %vm169_vm15 = vcmp.lt.s32.totalorder %v168_v63, 2 }
  0x4f   :  { %v143_v35 = vclz %v308_v33  ;;  %vm278_vm12 = vcmp.eq.s32.totalorder %v273_v0, 2  ;;  %vm275_vm14 = vcmp.eq.s32.totalorder %v273_v0, 0  ;;  %vm274_vm0 = vcmp.lt.s32.totalorder %v273_v0, 2 }
  0x51   :  { %v309_v36 = vadd.s32 4294967294, %v143_v35 }
  0x53   :  { %vm310_vm6 = vcmp.lt.s32.totalorder %v309_v36, 0 }
  0x54   :  { %v146_v39 = vsel %vm310_vm6, 0, %v309_v36 }
  0x55   :  { %v147_v40 = vsub.s32 32, %v146_v39  ;;  %v148_v41 = vshll.u32 %v139_v30, %v146_v39  ;;  %v151_v42 = vsub.s32 4294967266, %v146_v39 }
  0x57   :  { %v149_v44 = vshrl.u32 %v131_v37, %v147_v40  ;;  %v152_v45 = vadd.s32 127, %v151_v42 }
  0x59   :  { %v150_v46 = vor.u32 %v149_v44, %v148_v41  ;;  %v153_v47 = vshll.u32 %v152_v45, 23 }
  0x5b   :  { %v154_v49 = vor.u32 4788187, %v153_v47  ;;  %v157_v50 = vcvt.s32.f32 %v150_v46 }
  0x5d   :  { %v155_v52 = vand.u32 2147483647, %v154_v49 }
  0x5f   :  { %v158_v54 = vmul.f32 %v157_v50, %v155_v52 }
  0x61   :  { %v159_v56 = vxor.u32 2147483648, %v158_v54 }
  0x63   :  { %v160_v58 = vsel %vm77_vm7, %v159_v56, %v158_v54 }
  0x64   :  { %v163_v59 = vsel %vm76_vm8, %v392_v24, %v160_v58  ;;  %v289_v24 = vld [vmem:[%s442_s2] sm:$0xf] }
  0x65   :  { %334 = vcosq.f32 %v163_v59 }
  0x66   :  { %336 = vsinq.f32 %v163_v59 }
  0x6f   :  { %v335_v3 = vpop.eup %334 }
  0x70   :  { %v337_v27 = vpop.eup %336  ;;  %v174_v6 = vxor.u32 2147483648, %v335_v3 }
  0x71   :  { %v171_v7 = vxor.u32 2147483648, %v337_v27 }
  0x72   :  { %v175_v9 = vsel %vm173_vm11, %v174_v6, %v337_v27  ;;  %v280_v10 = vsel %vm278_vm12, %v174_v6, %v337_v27 }
  0x73   :  { %v172_v13 = vsel %vm170_vm13, %v335_v3, %v171_v7  ;;  %v277_v14 = vsel %vm275_vm14, %v335_v3, %v171_v7 }
  0x74   :  { %v176_v15 = vsel %vm169_vm15, %v172_v13, %v175_v9  ;;  %v281_v16 = vsel %vm274_vm0, %v277_v14, %v280_v10 }
  0x75   :  { %v177_v17 = vsel %vm167_vm1, nan, %v176_v15  ;;  %v282_v18 = vsel %vm167_vm1, nan, %v281_v16 }
  0x76   :  { %v178_v19 = vmul.f32 %v177_v17, %v73_v12  ;;  %v283_v20 = vmul.f32 %v282_v18, %v73_v12 }
  0x78   :  { %v285_v22 = vrot.slane %v283_v20, 6 }
  0x7a   :  { %v288_v25 = vsel %vm287_vm2, %v178_v19, %v285_v22 }
  0x7b   :  { %v290_v23 = vmul.f32 %v288_v25, %v27_v21 }
  0x7d   :  { %v291_v26 = vadd.f32 %v290_v23, %v289_v24 }
  0x7f   :  { %292 = vst [vmem:[#allocation4] sm:$0xf] %v291_v26 }
  0x80   :  { %349 = shalt.err (!%p346_p4)
}
  0x81   :  { %s350_s27 = scalar_lea.hbm %s443_s3, 64 }
  0x82   :  { %p351_p5 = scmp.ne.s32.totalorder %s443_s3, %s350_s27  ;;  %p354_p6 = scmp.lt.u32.totalorder %s350_s27, %s443_s3 }
  0x84   :  { %p356_p7 = pnand %p354_p6, %p351_p5 }
  0x86   :  { %359 = shalt.err (!%p356_p7)
}
  0x87   :  { %302 = dma.vmem_to_hbm [thread:$0]  %s300_s23, 64, %s443_s3, [#allocation5]  }
  0x88   :  { %360 = dma.done.wait [#allocation5], 64  }
  0x89   :  { %361 = vsyncadd [#allocation5], 4294967232 }
  0x8a   :  { %306 = vsyncpa [#allocation5], 1 }

</bundles_post_ra>
